<compile_context>
chip_gen: v7x
topology: tpu7x:2x2x1
jax: 0.10.0
libtpu: 0.0.40
codegen_flags: <defaults>
</compile_context>

<pallas_src>
import functools

import jax
import jax.numpy as jnp
from jax import lax
from jax.experimental import pallas as pl
from jax.experimental.pallas import tpu as pltpu

EPS = 1e-10
_LANE = 128
_SUBLANE = 8


def _cdiv(a, b):
    return -(-a // b)


def _round_up(a, b):
    return _cdiv(a, b) * b


def _vmem_limit_bytes():
    """Generation-aware scoped-VMEM limit.

    v5e/v6e: 128 MiB physical -> ~112 MiB scoped (small compiler reserve);
    v7x:      64 MiB physical -> ~48 MiB scoped.
    """
    cap = 64 * 1024 * 1024  # conservative default = v7x per-TC physical VMEM
    try:
        cap = int(getattr(pltpu.get_tpu_info(), "vmem_capacity_bytes", cap))
    except Exception:
        pass
    return max((3 * cap) // 4, cap - 16 * 1024 * 1024)


# --------------------------- kernels ---------------------------------------


def _normalize_rows_kernel(x_ref, o_ref):
    """Single-pass: whole (block_b, T) row block resident in VMEM (T unpadded)."""
    x = x_ref[...].astype(jnp.float32)
    inv_n = 1.0 / x.shape[-1]  # block spans the full, unpadded time axis
    mean = jnp.sum(x, axis=-1, keepdims=True) * inv_n
    centered = x - mean
    var = jnp.sum(centered * centered, axis=-1, keepdims=True) * inv_n  # unbiased=False
    # exact reciprocal on a tiny (block_b, 1) column -- off the critical path.
    inv = 1.0 / (jnp.sqrt(var) + EPS)
    o_ref[...] = (centered * inv).astype(o_ref.dtype)


def _stats_kernel(x_ref, sum_ref, sq_ref, *, block_t, t_valid):
    """Fused sum / sum-of-squares, accumulated across the time grid axis."""
    j = pl.program_id(1)

    @pl.when(j == 0)
    def _():
        sum_ref[...] = jnp.zeros_like(sum_ref)
        sq_ref[...] = jnp.zeros_like(sq_ref)

    x = x_ref[...].astype(jnp.float32)
    if t_valid % block_t:  # static: only then does the edge tile read OOB columns
        col = lax.broadcasted_iota(jnp.int32, x.shape, dimension=1)
        x = jnp.where(col < (t_valid - j * block_t), x, 0.0)
    sum_ref[...] += jnp.sum(x, axis=-1, keepdims=True)
    sq_ref[...] += jnp.sum(x * x, axis=-1, keepdims=True)


def _apply_kernel(mean_ref, inv_ref, x_ref, o_ref):
    x = x_ref[...].astype(jnp.float32)
    o_ref[...] = ((x - mean_ref[...]) * inv_ref[...]).astype(o_ref.dtype)


# --------------------------- wrappers ---------------------------------------


def _pick_block_b(n_rows, t, itemsize, row_align, budget, per_row):
    """Rows per grid step for the single-pass kernel. 0 -> use two-pass path."""
    fit = budget // per_row  # rows whose full working set fits in VMEM
    if fit < min(row_align, n_rows):
        return 0
    if n_rows <= row_align:
        return n_rows  # one full-dim block: exempt from the 8-rule, no OOB rows
    bb_cap = (fit // row_align) * row_align
    # target ~8 MiB of input per grid step (keeps the ~0.35us per-step
    # overhead < ~5% even at v7x HBM bandwidth) ...
    target = _round_up(_cdiv(8 << 20, max(1, t * itemsize)), row_align)
    bb = max(row_align, min(bb_cap, target, _round_up(n_rows, row_align)))
    # ... but prefer >= 4 grid steps (>= ~2 per v7x TensorCore so fetch and
    # writeback pipeline) while blocks stay >= ~1 MiB of input.
    while bb > row_align and _cdiv(n_rows, bb) < 4:
        smaller = max(row_align, _round_up(_cdiv(bb, 2), row_align))
        if smaller == bb or smaller * t * itemsize < (1 << 20):
            break
        bb = smaller
    if bb >= n_rows:
        bb = n_rows  # single block anyway: use the exact full dim (no OOB rows)
    return bb


def _normalize_rows(x, *, force_two_pass=False, max_block_t=None):
    n_rows, t = x.shape
    dtype = x.dtype
    itemsize = jnp.dtype(dtype).itemsize
    row_align = _SUBLANE * max(1, 4 // max(1, itemsize))  # 8 f32 / 16 bf16 / 32 i8

    vmem_limit = _vmem_limit_bytes()
    budget = (vmem_limit * 9) // 10  # small headroom over the true working set

    # Per-row VMEM for the single-pass kernel: double-buffered input (2*item)
    # + double-buffered output (2*item) + ~3 f32 working rows.
    per_row = t * (4 * itemsize + 12)

    block_b = 0 if force_two_pass else _pick_block_b(
        n_rows, t, itemsize, row_align, budget, per_row)

    if block_b:
        grid_b = _cdiv(n_rows, block_b)
        return pl.pallas_call(
            _normalize_rows_kernel,
            out_shape=jax.ShapeDtypeStruct((n_rows, t), dtype),
            grid_spec=pltpu.PrefetchScalarGridSpec(
                num_scalar_prefetch=0,
                grid=(grid_b,),
                # time block == full T: no padding, no output slice, no mask.
                # Row remainder blocks read garbage rows that are discarded by
                # the masked OOB write.
                in_specs=[pl.BlockSpec((block_b, t), lambda i: (i, 0))],
                out_specs=pl.BlockSpec((block_b, t), lambda i: (i, 0)),
            ),
            compiler_params=pltpu.CompilerParams(
                dimension_semantics=("parallel",),
                vmem_limit_bytes=vmem_limit,
            ),
        )(x)

    # ---- tiled-time two-pass fallback for very long audio -------------------
    block_b = n_rows if n_rows <= row_align else row_align
    per_elem = 4 * itemsize + 8  # sized against the apply kernel (the larger)
    cap_t = max(_LANE, (budget // (block_b * per_elem)) // _LANE * _LANE)
    target_t = max(_LANE, ((8 << 20) // (block_b * itemsize)) // _LANE * _LANE)
    block_t = min(cap_t, target_t, _round_up(t, _LANE))
    if max_block_t is not None:
        block_t = min(block_t, _round_up(max_block_t, _LANE))
    nb, nt = _cdiv(n_rows, block_b), _cdiv(t, block_t)

    sums, sqs = pl.pallas_call(
        functools.partial(_stats_kernel, block_t=block_t, t_valid=t),
        out_shape=(
            jax.ShapeDtypeStruct((n_rows, 1), jnp.float32),
            jax.ShapeDtypeStruct((n_rows, 1), jnp.float32),
        ),
        grid_spec=pltpu.PrefetchScalarGridSpec(
            num_scalar_prefetch=0,
            grid=(nb, nt),
            in_specs=[pl.BlockSpec((block_b, block_t), lambda i, j: (i, j))],
            out_specs=(
                pl.BlockSpec((block_b, 1), lambda i, j: (i, 0)),
                pl.BlockSpec((block_b, 1), lambda i, j: (i, 0)),
            ),
        ),
        compiler_params=pltpu.CompilerParams(
            dimension_semantics=("parallel", "arbitrary"),
            vmem_limit_bytes=vmem_limit,
        ),
    )(x)
    # NOTE: when nb == 1 (tiny B*C, very long audio) only one v7x TensorCore
    # is busy in the stats pass; a parallel split of the time axis (combining
    # partial sums in the epilogue) would recover ~2x there.

    # tiny (n_rows, 1) epilogue in plain JAX.
    # NOTE: var = E[x^2] - mean^2 can cancel when |mean| >> std; fine for raw
    # audio (near-zero mean).  The single-pass path keeps the centered form.
    inv_n = 1.0 / t
    mean = sums * inv_n
    var = jnp.maximum(sqs * inv_n - mean * mean, 0.0)
    inv = 1.0 / (jnp.sqrt(var) + EPS)

    return pl.pallas_call(
        _apply_kernel,
        out_shape=jax.ShapeDtypeStruct((n_rows, t), dtype),
        grid_spec=pltpu.PrefetchScalarGridSpec(
            num_scalar_prefetch=0,
            grid=(nb, nt),
            in_specs=[
                pl.BlockSpec((block_b, 1), lambda i, j: (i, 0)),
                pl.BlockSpec((block_b, 1), lambda i, j: (i, 0)),
                pl.BlockSpec((block_b, block_t), lambda i, j: (i, j)),
            ],
            out_specs=pl.BlockSpec((block_b, block_t), lambda i, j: (i, j)),
        ),
        compiler_params=pltpu.CompilerParams(
            dimension_semantics=("parallel", "parallel"),
            vmem_limit_bytes=vmem_limit,
        ),
    )(mean, inv, x)


def normalize_audio(x, *, force_two_pass=False, max_block_t=None):
    """Pallas equivalent of NormalizeAudio.forward.

    Accepts (B, T) or (B, C, T); normalizes over time per (batch, channel)
    row and squeezes a size-1 channel dim from the output (like torch).
    """
    if x.ndim == 2:
        b, t = x.shape
        rows = x                                  # already (rows, T); no copy
        out_shape = (b, t)
    elif x.ndim == 3:
        b, c, t = x.shape
        rows = x.reshape(b * c, t)                # contiguous collapse: free
        out_shape = (b, t) if c == 1 else (b, c, t)
    else:
        raise ValueError("expected (B, T) or (B, C, T) input")
    out = _normalize_rows(rows, force_two_pass=force_two_pass,
                          max_block_t=max_block_t)
    return out.reshape(out_shape)


def _reference(x):
    if x.ndim == 2:
        x = x[:, None, :]
    mean = jnp.mean(x, axis=2, keepdims=True)
    std = jnp.sqrt(jnp.mean((x - mean) ** 2, axis=2, keepdims=True))
    out = (x - mean) / (std + EPS)
    return out[:, 0, :] if out.shape[1] == 1 else out


if __name__ == "__main__":
    key = jax.random.PRNGKey(0)
    # small, deliberately non-aligned shapes to exercise the pad-free paths.
    B, T = 6, 1000
    x = jax.random.normal(key, (B, T), dtype=jnp.float32) * 0.3 + 0.1
    ref = _reference(x)
    tol = 1e-4  # exact divide now; only reduction-order differences remain

    # fast single-pass path
    out = jax.block_until_ready(normalize_audio(x))
    assert out.shape == (B, T)
    assert float(jnp.max(jnp.abs(out - ref))) < tol

    # (B, 1, T) input path (channel squeezed back out, like torch)
    out3 = jax.block_until_ready(normalize_audio(x[:, None, :]))
    assert out3.shape == (B, T)
    assert float(jnp.max(jnp.abs(out3 - ref))) < tol

    # (B, C, T) with C > 1 keeps the channel dim (torch .squeeze(1) is a no-op)
    xc = jax.random.normal(jax.random.PRNGKey(1), (2, 3, 512), jnp.float32)
    outc = jax.block_until_ready(normalize_audio(xc))
    assert outc.shape == (2, 3, 512)
    assert float(jnp.max(jnp.abs(outc - _reference(xc)))) < tol

    # tiled-time two-pass fallback (forced so it is exercised at small shape)
    out2 = jax.block_until_ready(
        normalize_audio(x, force_two_pass=True, max_block_t=256)
    )
    assert out2.shape == (B, T)
    assert float(jnp.max(jnp.abs(out2 - ref))) < tol

    print("KERNEL_OK")
</pallas_src>

<mosaic_0001>
module attributes {stable_mosaic.version = 11 : i64} {
  func.func @_normalize_rows_kernel(%arg0: i32, %arg1: memref<6x1000xf32, #tpu.memory_space<vmem>>, %arg2: memref<6x1000xf32, #tpu.memory_space<vmem>>) attributes {dimension_semantics = [#tpu.dimension_semantics<parallel>], iteration_bounds = array<i64: 1>, scalar_prefetch = 0 : i64, scratch_operands = 0 : i64, tpu.core_type = #tpu.core_type<tc>, window_params = [{transform_indices = @transform_0, window_bounds = array<i64: 6, 1000>}, {transform_indices = @transform_1, window_bounds = array<i64: 6, 1000>}]} {
    %c0 = arith.constant 0 : index
    %c0_0 = arith.constant 0 : index
    %0 = vector.load %arg1[%c0, %c0_0] : memref<6x1000xf32, #tpu.memory_space<vmem>>, vector<6x1000xf32>
    %cst = arith.constant dense<0.000000e+00> : vector<6xf32>
    %1 = vector.multi_reduction <add>, %0, %cst [1] : vector<6x1000xf32> to vector<6xf32>
    %2 = vector.shape_cast %1 : vector<6xf32> to vector<6x1xf32>
    %cst_1 = arith.constant 1.000000e-03 : f32
    %3 = vector.broadcast %cst_1 : f32 to vector<6x1xf32>
    %4 = arith.mulf %2, %3 : vector<6x1xf32>
    %5 = vector.broadcast %4 : vector<6x1xf32> to vector<6x1000xf32>
    %6 = arith.subf %0, %5 : vector<6x1000xf32>
    %7 = arith.mulf %6, %6 : vector<6x1000xf32>
    %cst_2 = arith.constant dense<0.000000e+00> : vector<6xf32>
    %8 = vector.multi_reduction <add>, %7, %cst_2 [1] : vector<6x1000xf32> to vector<6xf32>
    %9 = vector.shape_cast %8 : vector<6xf32> to vector<6x1xf32>
    %cst_3 = arith.constant 1.000000e-03 : f32
    %10 = vector.broadcast %cst_3 : f32 to vector<6x1xf32>
    %11 = arith.mulf %9, %10 : vector<6x1xf32>
    %12 = math.sqrt %11 : vector<6x1xf32>
    %cst_4 = arith.constant 1.000000e-10 : f32
    %13 = vector.broadcast %cst_4 : f32 to vector<6x1xf32>
    %14 = arith.addf %12, %13 : vector<6x1xf32>
    %cst_5 = arith.constant 1.000000e+00 : f32
    %15 = vector.broadcast %cst_5 : f32 to vector<6x1xf32>
    %16 = arith.divf %15, %14 : vector<6x1xf32>
    %17 = vector.broadcast %16 : vector<6x1xf32> to vector<6x1000xf32>
    %18 = arith.mulf %6, %17 : vector<6x1000xf32>
    %c0_6 = arith.constant 0 : index
    %c0_7 = arith.constant 0 : index
    %19 = vector.load %arg2[%c0_6, %c0_7] : memref<6x1000xf32, #tpu.memory_space<vmem>>, vector<6x1000xf32>
    tpu.vector_store %arg2[%c0_6, %c0_7], %18 {strides = array<i32>} : memref<6x1000xf32, #tpu.memory_space<vmem>>, vector<6x1000xf32>,
    return
  }
  func.func @transform_0(%arg0: i32) -> (i32, i32) {
    %c0_i32 = arith.constant 0 : i32
    %c0_i32_0 = arith.constant 0 : i32
    return %arg0, %c0_i32 : i32, i32
  }
  func.func @transform_1(%arg0: i32) -> (i32, i32) {
    %c0_i32 = arith.constant 0 : i32
    %c0_i32_0 = arith.constant 0 : i32
    return %arg0, %c0_i32 : i32, i32
  }
}

</mosaic_0001>

<bundles_post_ra>
// kernel: tpu_custom_call.1
= control target key start
LH: loop header
LB: loop body
LE: loop exit
PB: predicated region body
PF: predicated region fallthrough
CT: control target
= control target key end

     0   :  { %6 = vsyncpa [#allocation3], 0  ;;  %s231_s0 = inlined_call_operand.hbm [shape: f32[6,1000], index: 0, kind: input, shape index: {}]   ;;  %s232_s1 = inlined_call_operand.hbm [shape: f32[6,1000], index: 1, kind: output, shape index: {}]  }
   0x1   :  { %7 = vsyncpa [#allocation4], 0  ;;  %s178_s6 = smov [#allocation2]   ;;  %s130_s10 = scalar_lea.hbm %s231_s0, 1024 }
   0x2   :  { %s14_s7 = sshll.u32 %s178_s6, 4  ;;  %p131_p0 = scmp.ne.s32.totalorder %s231_s0, %s130_s10  ;;  %s15_s7 = int_to_ptr.vmem [resolvable:$true] %s14_s7 }
   0x3   :  { %p134_p1 = scmp.lt.u32.totalorder %s130_s10, %s231_s0 }
   0x5   :  { %p136_p2 = pnand %p134_p1, %p131_p0 }
   0x7   :  { %139 = shalt.err (!%p136_p2)
}
   0x8   :  { %s140_s15 = scalar_lea.vmem %s15_s7, 1024  ;;  %p145_p4 = scmp.lt.s32.totalorder %s15_s7, %s15_s7 }
   0x9   :  { %p141_p3 = scmp.ne.s32.totalorder %s15_s7, %s140_s15  ;;  %p146_p5 = scmp.lt.s32.totalorder %s140_s15, %s140_s15 }
   0xb   :  { %p147_p6 = por %p146_p5, %p145_p4 }
   0xd   :  { %p148_p7 = pnand %p147_p6, %p141_p3 }
   0xf   :  { %151 = shalt.err (!%p148_p7)
}
  0x10   :  { %17 = dma.hbm_to_vmem [thread:$0]  %s231_s0, 1024, %s15_s7, [#allocation3]  }
  0x11   :  { %174 = dma.done.wait [#allocation3], 1024  }
  0x12   :  { %175 = vsyncadd [#allocation3], 4294966272  ;;  %vm29_vm0 = vcmask 1045504   ;;  %v21_v0 = vld [vmem:[#allocation2] sm:$0x3f]  ;;  %vm43_vm1 = vcmask 848896  }
  0x13   :  { %v22_v1 = vld [vmem:[#allocation2 + $0x8] sm:$0x3f]  ;;  %v23_v2 = vld [vmem:[#allocation2 + $0x10] sm:$0x3f]  ;;  %v24_v3 = vld [vmem:[#allocation2 + $0x18] sm:$0x3f] }
  0x14   :  { %v30_v4 = vsel %vm29_vm0, %v21_v0, 0.0  ;;  %v31_v5 = vsel %vm29_vm0, %v22_v1, 0.0  ;;  %v25_v6 = vld [vmem:[#allocation2 + $0x20] sm:$0x3f]  ;;  %v33_v8 = vsel %vm29_vm0, %v23_v2, 0.0  ;;  %v35_v9 = vsel %vm29_vm0, %v24_v3, 0.0 }
  0x15   :  { %v32_v7 = vadd.f32 %v31_v5, %v30_v4  ;;  %v26_v10 = vld [vmem:[#allocation2 + $0x28] sm:$0x3f]  ;;  %v37_v12 = vsel %vm29_vm0, %v25_v6, 0.0  ;;  %v27_v13 = vld [vmem:[#allocation2 + $0x30] sm:$0x3f]  ;;  %s179_s0 = smov [#allocation5]  }
  0x16   :  { %v39_v15 = vsel %vm29_vm0, %v26_v10, 0.0  ;;  %v28_v16 = vld [vmem:[#allocation2 + $0x38] sm:$0x3f]  ;;  %v41_v18 = vsel %vm29_vm0, %v27_v13, 0.0  ;;  %s115_s18 = sshll.u32 %s179_s0, 4  ;;  %s116_s18 = int_to_ptr.vmem [resolvable:$true] %s115_s18 }
  0x17   :  { %v34_v11 = vadd.f32 %v33_v8, %v32_v7  ;;  %v44_v20 = vsel %vm43_vm1, %v28_v16, 0.0  ;;  %s152_s19 = scalar_lea.vmem %s116_s18, 1024  ;;  %p157_p9 = scmp.lt.s32.totalorder %s116_s18, %s116_s18 }
  0x18   :  { %p153_p8 = scmp.ne.s32.totalorder %s116_s18, %s152_s19  ;;  %p158_p10 = scmp.lt.s32.totalorder %s152_s19, %s152_s19 }
  0x19   :  { %v36_v14 = vadd.f32 %v35_v9, %v34_v11 }
  0x1a   :  { %p159_p11 = por %p158_p10, %p157_p9 }
  0x1b   :  { %v38_v17 = vadd.f32 %v37_v12, %v36_v14 }
  0x1c   :  { %p160_p12 = pnand %p159_p11, %p153_p8 }
  0x1d   :  { %v40_v19 = vadd.f32 %v39_v15, %v38_v17 }
  0x1f   :  { %v42_v21 = vadd.f32 %v41_v18, %v40_v19 }
  0x21   :  { %v45_v22 = vadd.f32 %v44_v20, %v42_v21 }
  0x23   :  { %46 = vadd.xlane.f32.xlu0 %v45_v22 }
  0xb0   :  { %v47_v23 = vpop.xlane.xlu0 %46 }
  0xb1   :  { %v48_v24 = vmul.f32 0.001, %v47_v23 }
  0xb3   :  { %v49_v25 = vsub.f32 %v21_v0, %v48_v24  ;;  %v50_v26 = vsub.f32 %v22_v1, %v48_v24  ;;  %v51_v27 = vsub.f32 %v23_v2, %v48_v24  ;;  %v52_v28 = vsub.f32 %v24_v3, %v48_v24 }
  0xb4   :  { %v53_v29 = vsub.f32 %v25_v6, %v48_v24  ;;  %v54_v33 = vsub.f32 %v26_v10, %v48_v24  ;;  %v55_v38 = vsub.f32 %v27_v13, %v48_v24  ;;  %v56_v42 = vsub.f32 %v28_v16, %v48_v24 }
  0xb5   :  { %v57_v30 = vmul.f32 %v49_v25, %v49_v25  ;;  %v58_v31 = vmul.f32 %v50_v26, %v50_v26  ;;  %v59_v32 = vmul.f32 %v51_v27, %v51_v27  ;;  %v60_v34 = vmul.f32 %v52_v28, %v52_v28 }
  0xb6   :  { %v61_v39 = vmul.f32 %v53_v29, %v53_v29  ;;  %v62_v43 = vmul.f32 %v54_v33, %v54_v33  ;;  %v63_v46 = vmul.f32 %v55_v38, %v55_v38  ;;  %v64_v49 = vmul.f32 %v56_v42, %v56_v42 }
  0xb7   :  { %v65_v35 = vsel %vm29_vm0, %v57_v30, 0.0  ;;  %v66_v36 = vsel %vm29_vm0, %v58_v31, 0.0  ;;  %v68_v40 = vsel %vm29_vm0, %v59_v32, 0.0  ;;  %v70_v44 = vsel %vm29_vm0, %v60_v34, 0.0 }
  0xb8   :  { %v67_v37 = vadd.f32 %v66_v36, %v65_v35  ;;  %v72_v47 = vsel %vm29_vm0, %v61_v39, 0.0  ;;  %v74_v50 = vsel %vm29_vm0, %v62_v43, 0.0  ;;  %v76_v52 = vsel %vm29_vm0, %v63_v46, 0.0 }
  0xb9   :  { %v78_v54 = vsel %vm43_vm1, %v64_v49, 0.0 }
  0xba   :  { %v69_v41 = vadd.f32 %v68_v40, %v67_v37 }
  0xbc   :  { %v71_v45 = vadd.f32 %v70_v44, %v69_v41 }
  0xbe   :  { %v73_v48 = vadd.f32 %v72_v47, %v71_v45 }
  0xc0   :  { %v75_v51 = vadd.f32 %v74_v50, %v73_v48 }
  0xc2   :  { %v77_v53 = vadd.f32 %v76_v52, %v75_v51 }
  0xc4   :  { %v79_v55 = vadd.f32 %v78_v54, %v77_v53 }
  0xc6   :  { %80 = vadd.xlane.f32.xlu0 %v79_v55 }
 0x153   :  { %v81_v56 = vpop.xlane.xlu0 %80 }
 0x154   :  { %v82_v57 = vmul.f32 0.001, %v81_v56 }
 0x156   :  { %126 = vrsqrt.f32 %v82_v57  ;;  %vm85_vm2 = vcmp.eq.f32.partialorder %v82_v57, inf  ;;  %v88_v60 = vand.u32 2147483648, %v82_v57  ;;  %vm87_vm3 = vcmp.eq.f32.partialorder %v82_v57, 0.0 }
 0x160   :  { %v127_v58 = vpop.eup %126 }
 0x161   :  { %v84_v59 = vmul.f32 %v127_v58, %v82_v57 }
 0x163   :  { %v86_v61 = vsel %vm85_vm2, %v82_v57, %v84_v59 }
 0x164   :  { %v89_v62 = vsel %vm87_vm3, %v88_v60, %v86_v61 }
 0x165   :  { %v90_v63 = vadd.f32 1e-10, %v89_v62 }
 0x167   :  { %128 = vrcp.f32 %v90_v63 }
 0x171   :  { %v129_v0 = vpop.eup %128 }
 0x172   :  { %v93_v1 = vmul.f32 %v129_v0, %v49_v25  ;;  %v94_v2 = vmul.f32 %v129_v0, %v50_v26  ;;  %v95_v3 = vmul.f32 %v129_v0, %v51_v27  ;;  %v96_v4 = vmul.f32 %v129_v0, %v52_v28 }
 0x173   :  { %v97_v5 = vmul.f32 %v129_v0, %v53_v29  ;;  %v98_v6 = vmul.f32 %v129_v0, %v54_v33  ;;  %v99_v7 = vmul.f32 %v129_v0, %v55_v38  ;;  %v100_v8 = vmul.f32 %v129_v0, %v56_v42 }
 0x174   :  { %101 = vst [vmem:[#allocation5] sm:$0x3f] %v93_v1  ;;  %102 = vst [vmem:[#allocation5 + $0x8] sm:$0x3f] %v94_v2 }
 0x175   :  { %103 = vst [vmem:[#allocation5 + $0x10] sm:$0x3f] %v95_v3  ;;  %104 = vst [vmem:[#allocation5 + $0x18] sm:$0x3f] %v96_v4 }
 0x176   :  { %105 = vst [vmem:[#allocation5 + $0x20] sm:$0x3f] %v97_v5  ;;  %106 = vst [vmem:[#allocation5 + $0x28] sm:$0x3f] %v98_v6 }
 0x177   :  { %107 = vst [vmem:[#allocation5 + $0x30] sm:$0x3f] %v99_v7  ;;  %108 = vst.msk [vmem:[#allocation5 + $0x38] sm:$0x3f] %vm43_vm1, %v100_v8 }
 0x178   :  { %163 = shalt.err (!%p160_p12)
}
 0x179   :  { %s164_s22 = scalar_lea.hbm %s232_s1, 1024 }
 0x17a   :  { %p165_p13 = scmp.ne.s32.totalorder %s232_s1, %s164_s22  ;;  %p168_p0 = scmp.lt.u32.totalorder %s164_s22, %s232_s1 }
 0x17c   :  { %p170_p1 = pnand %p168_p0, %p165_p13 }
 0x17e   :  { %173 = shalt.err (!%p170_p1)
}
 0x17f   :  { %118 = dma.vmem_to_hbm [thread:$0]  %s116_s18, 1024, %s232_s1, [#allocation4]  }
 0x180   :  { %176 = dma.done.wait [#allocation4], 1024  }
 0x181   :  { %177 = vsyncadd [#allocation4], 4294966272 }
 0x182   :  { %122 = vsyncpa [#allocation3], 1 }
 0x183   :  { %123 = vsyncpa [#allocation4], 1 }

</bundles_post_ra>
